<compile_context>
chip_gen: v5e
topology: v5e:2x2
jax: 0.10.0
libtpu: 0.0.40
codegen_flags: <defaults>
</compile_context>

<pallas_src>
import jax
import jax.numpy as jnp
from jax.experimental import pallas as pl
from jax.experimental.pallas import tpu as pltpu


def _copy_kernel(x_ref, o_ref):
    # Whole-tile copy (trivial elementwise hot path; binding slot is vst/DMA).
    o_ref[...] = x_ref[...]


def _sublane_multiple(dtype) -> int:
    # Minimum sublane packing per dtype: 8 for 4-byte, 16 for 2-byte,
    # 32 for 1-byte element types.
    itemsize = jnp.dtype(dtype).itemsize
    return max(8, 32 // itemsize)


def pretrained_model_forward(x_nchw: jax.Array,
                             exercise_copy_kernel: bool = True) -> jax.Array:
    """Pass-through 'forward' of the parameter-free PretrainedModel base class.

    Args:
        x_nchw: float array of shape [B, C, H, W] (PyTorch NCHW convention).
        exercise_copy_kernel: when False, short-circuit the identity (zero
            HBM traffic — the true optimum for this parameter-free base class).

    Returns:
        Array identical to the input, same shape and dtype.
    """
    if not exercise_copy_kernel:
        return x_nchw

    B, C, H, W = x_nchw.shape
    dtype = x_nchw.dtype
    itemsize = jnp.dtype(dtype).itemsize
    sub = _sublane_multiple(dtype)

    # Natural lane-dense 2-D slab: free metadata reshape, no pad/slice copies.
    rows, cols = B * C, H * W
    x2d = x_nchw.reshape(rows, cols)

    # ~2 MiB per tile: double-buffered in + out = 4x tile ~= 8 MiB, well inside
    # v5e's 16 MiB scoped-VMEM default (and v6e/v7x's 32 MiB).
    target_tile_bytes = 2 << 20

    # ---- Lane (cols) tile. ----
    if cols % 128 == 0:
        lane_budget = max(128, (target_tile_bytes // (sub * itemsize)) // 128 * 128)
        tile_cols = min(cols, lane_budget)
    else:
        # Full-dim lane block is legal for any width (no 128 constraint).
        tile_cols = cols

    # ---- Row (sublane) tile. ----
    if rows < sub:
        # Full-dim sublane block is legal for any height.
        tile_rows = rows
    else:
        row_budget = max(sub, (target_tile_bytes // (tile_cols * itemsize)) // sub * sub)
        tile_rows = min(row_budget, (rows // sub) * sub)
        # v7x: make sure the 'parallel' grid has >= 2 steps when the row count
        # permits, so both TensorCores drive their own DMA stream.
        if pl.cdiv(rows, tile_rows) * pl.cdiv(cols, tile_cols) < 2 and rows >= 2 * sub:
            tile_rows = max(sub, ((rows // 2) // sub) * sub)

    grid = (pl.cdiv(rows, tile_rows), pl.cdiv(cols, tile_cols))

    # Only override the scoped-VMEM limit in the rare "huge non-128-aligned
    # row" case where even a minimal-sublane tile overflows the default.
    tile_bytes = tile_rows * tile_cols * itemsize
    footprint = 4 * tile_bytes  # double-buffered in + out
    cp_kwargs = dict(dimension_semantics=("parallel", "parallel"))
    if footprint > (12 << 20):
        cp_kwargs["vmem_limit_bytes"] = min(footprint + (4 << 20), 56 << 20)

    out2d = pl.pallas_call(
        _copy_kernel,
        out_shape=jax.ShapeDtypeStruct((rows, cols), dtype),
        grid=grid,
        in_specs=[pl.BlockSpec((tile_rows, tile_cols), lambda i, j: (i, j))],
        out_specs=pl.BlockSpec((tile_rows, tile_cols), lambda i, j: (i, j)),
        compiler_params=pltpu.CompilerParams(**cp_kwargs),
        cost_estimate=pl.CostEstimate(
            flops=0, transcendentals=0,
            bytes_accessed=2 * rows * cols * itemsize),
    )(x2d)

    return out2d.reshape(B, C, H, W)


if __name__ == "__main__":
    key = jax.random.PRNGKey(0)

    # Small NCHW input consistent with an image-model forward: batch=2,
    # channels=4, spatial=16x16, f32.
    x = jax.random.normal(key, (2, 4, 16, 16), dtype=jnp.float32)
    fwd = jax.jit(pretrained_model_forward)
    y = jax.block_until_ready(fwd(x))
    assert y.shape == x.shape and y.dtype == x.dtype
    assert bool(jnp.allclose(y, x))

    # bf16 input exercises the dtype-aware sublane tiling (16-row multiples)
    # and the >=2-grid-step split.
    xb = jax.random.normal(key, (4, 8, 16, 16), dtype=jnp.float32).astype(jnp.bfloat16)
    yb = jax.block_until_ready(fwd(xb))
    assert yb.shape == xb.shape and yb.dtype == xb.dtype
    assert bool(jnp.all(yb == xb))

    print("KERNEL_OK")
</pallas_src>

<mosaic_0001>
module attributes {stable_mosaic.version = 11 : i64} {
  func.func @_copy_kernel(%arg0: i32, %arg1: i32, %arg2: memref<8x256xf32, #tpu.memory_space<vmem>>, %arg3: memref<8x256xf32, #tpu.memory_space<vmem>>) attributes {dimension_semantics = [#tpu.dimension_semantics<parallel>, #tpu.dimension_semantics<parallel>], iteration_bounds = array<i64: 1, 1>, scalar_prefetch = 0 : i64, scratch_operands = 0 : i64, tpu.core_type = #tpu.core_type<tc>, window_params = [{transform_indices = @transform_0, window_bounds = array<i64: 8, 256>}, {transform_indices = @transform_1, window_bounds = array<i64: 8, 256>}]} {
    %c0 = arith.constant 0 : index
    %c0_0 = arith.constant 0 : index
    %0 = vector.load %arg2[%c0, %c0_0] : memref<8x256xf32, #tpu.memory_space<vmem>>, vector<8x256xf32>
    %c0_1 = arith.constant 0 : index
    %c0_2 = arith.constant 0 : index
    %1 = vector.load %arg3[%c0_1, %c0_2] : memref<8x256xf32, #tpu.memory_space<vmem>>, vector<8x256xf32>
    tpu.vector_store %arg3[%c0_1, %c0_2], %0 {strides = array<i32>} : memref<8x256xf32, #tpu.memory_space<vmem>>, vector<8x256xf32>,
    return
  }
  func.func @transform_0(%arg0: i32, %arg1: i32) -> (i32, i32) {
    %c0_i32 = arith.constant 0 : i32
    return %arg0, %arg1 : i32, i32
  }
  func.func @transform_1(%arg0: i32, %arg1: i32) -> (i32, i32) {
    %c0_i32 = arith.constant 0 : i32
    return %arg0, %arg1 : i32, i32
  }
}

</mosaic_0001>

<bundles_post_ra>
// kernel: pretrained_model_forward.1
= control target key start
LH: loop header
LB: loop body
LE: loop exit
PB: predicated region body
PF: predicated region fallthrough
CT: control target
= control target key end

     0   :  { %s38_s0 = inlined_call_operand.vmem [shape: f32[8,256], index: 0, kind: input, shape index: {}]   ;;  %s39_s1 = inlined_call_operand.vmem [shape: f32[8,256], index: 1, kind: output, shape index: {}]  }
   0x1   :  { %v8_v0 = vld [vmem:[%s38_s0] sm:$0xff]  ;;  %v9_v1 = vld [vmem:[%s38_s0 + $0x8] sm:$0xff] }
   0x2   :  { %10 = vst [vmem:[%s39_s1] sm:$0xff] %v8_v0 }
   0x3   :  { %11 = vst [vmem:[%s39_s1 + $0x8] sm:$0xff] %v9_v1 }

</bundles_post_ra>
